<compile_context>
chip_gen: v7x
topology: tpu7x:2x2x1
jax: 0.10.0
libtpu: 0.0.40
codegen_flags: <defaults>
</compile_context>

<pallas_src>
import functools
import math

import jax
import jax.numpy as jnp
from jax.experimental import pallas as pl
from jax.experimental.pallas import tpu as pltpu


def _round_up(n, m):
    return ((n + m - 1) // m) * m


@functools.lru_cache(maxsize=1)
def _vmem_capacity_bytes():
    """Physical VMEM size (per TensorCore); conservative fallback if unknown."""
    try:
        info = pltpu.get_tpu_info()
        cap = getattr(info, "vmem_capacity_bytes", None)
        if cap:
            return int(cap)
    except Exception:
        pass
    return 64 * 1024 * 1024  # v7x per-core size: safe everywhere


def _find_exact_tile(n, cap, g):
    """Largest multiple-of-g divisor of n that is <= cap (None if none exists)."""
    if n <= cap and n % g == 0:
        return n
    start = (min(cap, n) // g) * g
    for cand in range(start, g - 1, -g):
        if n % cand == 0:
            return cand
    return None


def _partial_dot_kernel(x_ref, w_ref, p_ref, acc_ref, *, rows_total, r_tile,
                        needs_mask):
    """One grid step: accumulate a (bt, r_tile, lane) slab into a lane-wide acc.

    x_ref:   (bt, R, L) input slab
    w_ref:   (R, L)     matching slice of the linear weight
    p_ref:   (1, bt, 1) per-(core-split, batch-tile) partial sums (epilogue only)
    acc_ref: (bt, L)    f32 lane-wide accumulator scratch (persists over k)
    """
    k = pl.program_id(2)
    nk = pl.num_programs(2)

    @pl.when(k == 0)
    def _():
        acc_ref[...] = jnp.zeros_like(acc_ref)

    x = x_ref[...].astype(jnp.float32)          # (bt, R, L)
    w = w_ref[...].astype(jnp.float32)          # (R, L)

    if needs_mask:
        # Ragged last row block: mask garbage rows explicitly (garbage may be
        # NaN/Inf, so zeroed weights alone are not enough).
        start = (pl.program_id(0) * nk + k) * r_tile
        rid = jax.lax.broadcasted_iota(jnp.int32, w.shape, 0)
        valid = rid < (rows_total - start)
        w = jnp.where(valid, w, 0.0)
        x = jnp.where(valid[None, :, :], x, 0.0)

    # Vectorized over the batch tile: one (bt, lane) update per step, weight
    # vregs reused across all bt rows.  Cross-lane reduce deferred to epilogue.
    acc_ref[...] += jnp.sum(x * w[None, :, :], axis=1)

    @pl.when(k == nk - 1)
    def _():
        p_ref[0] = jnp.sum(acc_ref[...], axis=-1, keepdims=True)   # (bt, 1)


def _combine_kernel(p_ref, b_ref, o_ref):
    """Combine per-core partial sums, add bias, apply sigmoid."""
    z = jnp.sum(p_ref[...], axis=0) + b_ref[0]      # (B, 1)
    o_ref[...] = 1.0 / (1.0 + jnp.exp(-z))


@functools.partial(jax.jit, static_argnames=("max_block_rows",))
def deepfake_detector_forward(x, weight, bias, *, max_block_rows=None):
    """sigmoid(flatten(x) @ weight.T + bias).

    x:      (B, nb_frames, 3, H, W)
    weight: (1, F) with F = nb_frames * 3 * H * W
    bias:   (1,)
    Returns (B, 1) float32 probabilities.
    """
    B = x.shape[0]
    F = math.prod(x.shape[1:])
    assert weight.shape == (1, F), (weight.shape, F)

    isz = jnp.dtype(x.dtype).itemsize
    g = {4: 8, 2: 16, 1: 32}.get(isz, 8)            # sublane granularity

    # ---- Factor the feature axis as (rows, lane); copy-free reshape. ----------
    lane = 512 if F % 512 == 0 else (256 if F % 256 == 0 else 128)
    if F % lane == 0:
        rows = F // lane
        x3d = x.reshape(B, rows, lane)              # row-major == nn.Flatten order
        w2d = weight.reshape(rows, lane)
    else:
        # Rare fallback (F not a multiple of 128): zero-pad (one extra copy of x).
        # TODO(synk): replace with an in-kernel lane-tail mask to avoid the copy.
        F_pad = _round_up(F, lane)
        rows = F_pad // lane
        x3d = jnp.pad(x.reshape(B, F), ((0, 0), (0, F_pad - F))).reshape(B, rows, lane)
        w2d = jnp.pad(weight.reshape(F), (0, F_pad - F)).reshape(rows, lane)

    # ---- Batch tiling (amortizes weight streaming; output tiles stay legal). --
    if B % 8 == 0:
        bt = 16 if B % 16 == 0 else 8
    elif B > 8:
        # Ragged last batch tile: out-of-bounds rows read garbage, but that
        # garbage only feeds out-of-bounds output rows, which Pallas drops.
        bt = 8
    else:
        bt = B
    nb = -(-B // bt)

    # ---- Generation-aware VMEM budget -> row tile cap. ------------------------
    vmem_cap = _vmem_capacity_bytes()
    budget = min(vmem_cap // 3, 40 * 1024 * 1024)
    vmem_limit = min((vmem_cap * 3) // 4, budget + 24 * 1024 * 1024)
    w_isz = jnp.dtype(w2d.dtype).itemsize
    # Per r_tile row: double-buffered x block + f32 product temp
    # (+ f32 cast temp for narrow inputs) + double-buffered weight block.
    per_row = lane * (bt * (2 * isz + 4 + (0 if isz == 4 else 4)) + 2 * w_isz)
    r_cap = max(g, ((budget // per_row) // g) * g)
    if max_block_rows is not None:
        r_cap = max(g, (min(r_cap, max_block_rows) // g) * g)

    # ---- Row tiling; split reduction across cores when batch grid is 1-wide. --
    ksplit, r_tile, nk, needs_mask = 1, None, None, False
    if nb == 1 and rows % (2 * g) == 0:
        half = rows // 2
        t = _find_exact_tile(half, r_cap, g)
        if t is not None:
            ksplit, r_tile, nk = 2, t, half // t
    if ksplit == 1:
        if rows <= r_cap:
            r_tile, nk = rows, 1                     # single block == full dim
        else:
            t = _find_exact_tile(rows, r_cap, g)
            if t is not None:
                r_tile, nk = t, rows // t
            else:
                r_tile, nk, needs_mask = r_cap, -(-rows // r_cap), True

    grid = (ksplit, nb, nk)
    nk_const = nk

    x_spec = pl.BlockSpec((bt, r_tile, lane), lambda c, b, k: (b, c * nk_const + k, 0))
    w_spec = pl.BlockSpec((r_tile, lane), lambda c, b, k: (c * nk_const + k, 0))
    p_spec = pl.BlockSpec((1, bt, 1), lambda c, b, k: (c, b, 0))

    kernel = functools.partial(_partial_dot_kernel, rows_total=rows,
                               r_tile=r_tile, needs_mask=needs_mask)

    partials = pl.pallas_call(
        kernel,
        out_shape=jax.ShapeDtypeStruct((ksplit, B, 1), jnp.float32),
        grid_spec=pltpu.PrefetchScalarGridSpec(
            num_scalar_prefetch=0,
            grid=grid,
            in_specs=[x_spec, w_spec],
            out_specs=p_spec,
            scratch_shapes=[pltpu.VMEM((bt, lane), jnp.float32)],
        ),
        compiler_params=pltpu.CompilerParams(
            dimension_semantics=("parallel", "parallel", "arbitrary"),
            vmem_limit_bytes=int(vmem_limit),
        ),
    )(x3d, w2d)

    bias_f32 = bias.reshape(1).astype(jnp.float32)
    return pl.pallas_call(
        _combine_kernel,
        out_shape=jax.ShapeDtypeStruct((B, 1), jnp.float32),
        in_specs=[pl.BlockSpec(memory_space=pltpu.MemorySpace.VMEM),
                  pl.BlockSpec(memory_space=pltpu.MemorySpace.SMEM)],
        out_specs=pl.BlockSpec(memory_space=pltpu.MemorySpace.VMEM),
    )(partials, bias_f32)


if __name__ == "__main__":
    def _reference(x, w, b):
        B = x.shape[0]
        x2 = x.reshape(B, -1).astype(jnp.float32)
        w1 = w.reshape(-1).astype(jnp.float32)
        z = jnp.sum(x2 * w1[None, :], axis=1, keepdims=True) + b.astype(jnp.float32)
        return jax.nn.sigmoid(z)

    def _make(key, B, nbf, H, W):
        kx, kw, kb = jax.random.split(key, 3)
        F = nbf * 3 * H * W
        bound = 1.0 / math.sqrt(F)       # nn.Linear-style U(-1/sqrt(F), 1/sqrt(F))
        x = jax.random.normal(kx, (B, nbf, 3, H, W), dtype=jnp.float32)
        w = jax.random.uniform(kw, (1, F), minval=-bound, maxval=bound,
                               dtype=jnp.float32)
        b = jax.random.uniform(kb, (1,), minval=-bound, maxval=bound,
                               dtype=jnp.float32)
        return x, w, b

    key = jax.random.PRNGKey(0)
    keys = jax.random.split(key, 4)

    # Small configs consistent with the module (nb_frames video clips, 3 chans),
    # chosen to exercise the main code paths.
    cases = [
        # (B, nb_frames, H, W, max_block_rows)
        (2, 2, 16, 16, None),   # single block, single batch tile
        (2, 2, 64, 64, None),   # reduction split across two cores (v7x path)
        (2, 2, 64, 64, 8),      # multi-step k reduction (accumulator loop)
        (12, 2, 16, 16, None),  # ragged batch tiling (B not a multiple of 8)
    ]
    for kk, (B, nbf, H, W, mbr) in zip(keys, cases):
        x, w, b = _make(kk, B, nbf, H, W)
        y = jax.block_until_ready(
            deepfake_detector_forward(x, w, b, max_block_rows=mbr))
        ref = _reference(x, w, b)
        assert y.shape == (B, 1), (y.shape, B)
        assert jnp.allclose(y, ref, atol=2e-5, rtol=2e-5), (
            (B, nbf, H, W, mbr), float(jnp.max(jnp.abs(y - ref))))

    print("KERNEL_OK")
</pallas_src>

<mosaic_0001>
module attributes {stable_mosaic.version = 11 : i64} {
  func.func @_partial_dot_kernel(%arg0: i32, %arg1: i32, %arg2: i32, %arg3: memref<2x3x512xf32, #tpu.memory_space<vmem>>, %arg4: memref<3x512xf32, #tpu.memory_space<vmem>>, %arg5: memref<1x2x1xf32, #tpu.memory_space<vmem>>, %arg6: memref<2x512xf32, #tpu.memory_space<vmem>>) attributes {dimension_semantics = [#tpu.dimension_semantics<parallel>, #tpu.dimension_semantics<parallel>, #tpu.dimension_semantics<arbitrary>], iteration_bounds = array<i64: 1, 1, 1>, scalar_prefetch = 0 : i64, scratch_operands = 1 : i64, tpu.core_type = #tpu.core_type<tc>, window_params = [{transform_indices = @transform_0, window_bounds = array<i64: 2, 3, 512>}, {transform_indices = @transform_1, window_bounds = array<i64: 3, 512>}, {transform_indices = @transform_2, window_bounds = array<i64: 1, 2, 1>}]} {
    %c0_i32 = arith.constant 0 : i32
    %0 = arith.cmpi eq, %arg2, %c0_i32 : i32
    %1 = arith.extui %0 : i1 to i32
    %c0_i32_0 = arith.constant 0 : i32
    %2 = arith.cmpi ne, %1, %c0_i32_0 : i32
    scf.if %2 {
      %cst_11 = arith.constant 0.000000e+00 : f32
      %15 = vector.broadcast %cst_11 : f32 to vector<2x512xf32>
      %c0_12 = arith.constant 0 : index
      %c0_13 = arith.constant 0 : index
      %16 = vector.load %arg6[%c0_12, %c0_13] : memref<2x512xf32, #tpu.memory_space<vmem>>, vector<2x512xf32>
      tpu.vector_store %arg6[%c0_12, %c0_13], %15 {strides = array<i32>} : memref<2x512xf32, #tpu.memory_space<vmem>>, vector<2x512xf32>,
    } else {
    }
    %c0 = arith.constant 0 : index
    %c0_1 = arith.constant 0 : index
    %c0_2 = arith.constant 0 : index
    %3 = vector.load %arg3[%c0, %c0_1, %c0_2] : memref<2x3x512xf32, #tpu.memory_space<vmem>>, vector<2x3x512xf32>
    %c0_3 = arith.constant 0 : index
    %c0_4 = arith.constant 0 : index
    %4 = vector.load %arg4[%c0_3, %c0_4] : memref<3x512xf32, #tpu.memory_space<vmem>>, vector<3x512xf32>
    %c0_5 = arith.constant 0 : index
    %c0_6 = arith.constant 0 : index
    %5 = vector.load %arg6[%c0_5, %c0_6] : memref<2x512xf32, #tpu.memory_space<vmem>>, vector<2x512xf32>
    %6 = vector.shape_cast %4 : vector<3x512xf32> to vector<1x3x512xf32>
    %7 = vector.broadcast %6 : vector<1x3x512xf32> to vector<2x3x512xf32>
    %8 = arith.mulf %3, %7 : vector<2x3x512xf32>
    %cst = arith.constant dense<0.000000e+00> : vector<2x512xf32>
    %9 = vector.multi_reduction <add>, %8, %cst [1] : vector<2x3x512xf32> to vector<2x512xf32>
    %10 = arith.addf %5, %9 : vector<2x512xf32>
    %c0_7 = arith.constant 0 : index
    %c0_8 = arith.constant 0 : index
    %11 = vector.load %arg6[%c0_7, %c0_8] : memref<2x512xf32, #tpu.memory_space<vmem>>, vector<2x512xf32>
    tpu.vector_store %arg6[%c0_7, %c0_8], %10 {strides = array<i32>} : memref<2x512xf32, #tpu.memory_space<vmem>>, vector<2x512xf32>,
    %c0_i32_9 = arith.constant 0 : i32
    %12 = arith.cmpi eq, %arg2, %c0_i32_9 : i32
    %13 = arith.extui %12 : i1 to i32
    %c0_i32_10 = arith.constant 0 : i32
    %14 = arith.cmpi ne, %13, %c0_i32_10 : i32
    scf.if %14 {
      %c0_11 = arith.constant 0 : index
      %c0_12 = arith.constant 0 : index
      %15 = vector.load %arg6[%c0_11, %c0_12] : memref<2x512xf32, #tpu.memory_space<vmem>>, vector<2x512xf32>
      %cst_13 = arith.constant dense<0.000000e+00> : vector<2xf32>
      %16 = vector.multi_reduction <add>, %15, %cst_13 [1] : vector<2x512xf32> to vector<2xf32>
      %17 = vector.shape_cast %16 : vector<2xf32> to vector<2x1xf32>
      %c0_14 = arith.constant 0 : index
      %c0_15 = arith.constant 0 : index
      %c0_16 = arith.constant 0 : index
      %18 = vector.load %arg5[%c0_14, %c0_15, %c0_16] : memref<1x2x1xf32, #tpu.memory_space<vmem>>, vector<1x2x1xf32>
      %19 = vector.shape_cast %18 : vector<1x2x1xf32> to vector<2x1xf32>
      %20 = vector.shape_cast %17 : vector<2x1xf32> to vector<1x2x1xf32>
      tpu.vector_store %arg5[%c0_14, %c0_15, %c0_16], %20 {strides = array<i32>} : memref<1x2x1xf32, #tpu.memory_space<vmem>>, vector<1x2x1xf32>,
    } else {
    }
    return
  }
  func.func @transform_0(%arg0: i32, %arg1: i32, %arg2: i32) -> (i32, i32, i32) {
    %c1_i32 = arith.constant 1 : i32
    %0 = arith.muli %arg0, %c1_i32 : i32
    %1 = arith.addi %0, %arg2 : i32
    %c0_i32 = arith.constant 0 : i32
    %c0_i32_0 = arith.constant 0 : i32
    return %arg1, %1, %c0_i32 : i32, i32, i32
  }
  func.func @transform_1(%arg0: i32, %arg1: i32, %arg2: i32) -> (i32, i32) {
    %c1_i32 = arith.constant 1 : i32
    %0 = arith.muli %arg0, %c1_i32 : i32
    %1 = arith.addi %0, %arg2 : i32
    %c0_i32 = arith.constant 0 : i32
    %c0_i32_0 = arith.constant 0 : i32
    return %1, %c0_i32 : i32, i32
  }
  func.func @transform_2(%arg0: i32, %arg1: i32, %arg2: i32) -> (i32, i32, i32) {
    %c0_i32 = arith.constant 0 : i32
    %c0_i32_0 = arith.constant 0 : i32
    return %arg0, %arg1, %c0_i32 : i32, i32, i32
  }
}

module attributes {stable_mosaic.version = 11 : i64} {
  func.func @_combine_kernel(%arg0: memref<1x2x1xf32, #tpu.memory_space<vmem>>, %arg1: memref<1xf32, #tpu.memory_space<smem>>, %arg2: memref<2x1xf32, #tpu.memory_space<vmem>>) attributes {dimension_semantics = [], scalar_prefetch = 0 : i64, scratch_operands = 0 : i64, tpu.core_type = #tpu.core_type<tc>} {
    %c0 = arith.constant 0 : index
    %c0_0 = arith.constant 0 : index
    %c0_1 = arith.constant 0 : index
    %0 = vector.load %arg0[%c0, %c0_0, %c0_1] : memref<1x2x1xf32, #tpu.memory_space<vmem>>, vector<1x2x1xf32>
    %cst = arith.constant dense<0.000000e+00> : vector<2x1xf32>
    %1 = vector.multi_reduction <add>, %0, %cst [0] : vector<1x2x1xf32> to vector<2x1xf32>
    %c0_2 = arith.constant 0 : index
    %2 = memref.load %arg1[%c0_2] : memref<1xf32, #tpu.memory_space<smem>>
    %3 = vector.broadcast %2 : f32 to vector<2x1xf32>
    %4 = arith.addf %1, %3 : vector<2x1xf32>
    %cst_3 = arith.constant 0.000000e+00 : f32
    %5 = vector.broadcast %cst_3 : f32 to vector<2x1xf32>
    %6 = arith.subf %5, %4 : vector<2x1xf32>
    %7 = math.exp %6 : vector<2x1xf32>
    %cst_4 = arith.constant 1.000000e+00 : f32
    %8 = vector.broadcast %cst_4 : f32 to vector<2x1xf32>
    %9 = arith.addf %8, %7 : vector<2x1xf32>
    %cst_5 = arith.constant 1.000000e+00 : f32
    %10 = vector.broadcast %cst_5 : f32 to vector<2x1xf32>
    %11 = arith.divf %10, %9 : vector<2x1xf32>
    %c0_6 = arith.constant 0 : index
    %c0_7 = arith.constant 0 : index
    %12 = vector.load %arg2[%c0_6, %c0_7] : memref<2x1xf32, #tpu.memory_space<vmem>>, vector<2x1xf32>
    tpu.vector_store %arg2[%c0_6, %c0_7], %11 {strides = array<i32>} : memref<2x1xf32, #tpu.memory_space<vmem>>, vector<2x1xf32>,
    return
  }
}

</mosaic_0001>

<bundles_post_ra>
// kernel: deepfake_detector_forward.2
= control target key start
LH: loop header
LB: loop body
LE: loop exit
PB: predicated region body
PF: predicated region fallthrough
CT: control target
= control target key end

     0   :  { %vm79_vm0 = vcmask 1042432   ;;  %v149_v0 = vlaneseq  ;;  %v249_v4 = vmov 1983009808   ;;  %vm183_vm1 = vcmask 1041409   ;;  %s299_s0 = inlined_call_operand.vmem [shape: f32[2,3,512], index: 0, kind: input, shape index: {}]   ;;  %s300_s1 = inlined_call_operand.vmem [shape: f32[3,512], index: 1, kind: input, shape index: {}]   ;;  %s301_s2 = inlined_call_operand.vmem [shape: f32[1,2,1], index: 2, kind: output, shape index: {}]  }
   0x1   :  { %v56_v1 = vld [vmem:[%s299_s0] sm:$0x77]  ;;  %v57_v2 = vld [vmem:[%s299_s0 + $0x8] sm:$0x77]  ;;  %v58_v3 = vld [vmem:[%s299_s0 + $0x10] sm:$0x77]  ;;  %v274_v5 = vunpack.c.l.s4 %v249_v4 }
   0x2   :  { %v59_v6 = vld [vmem:[%s299_s0 + $0x18] sm:$0x77]  ;;  %v60_v7 = vld [vmem:[%s300_s1] sm:$0x77]  ;;  %v61_v8 = vld [vmem:[%s300_s1 + $0x8] sm:$0x77] }
   0x3   :  { %v63_v9 = vmul.f32 %v60_v7, %v56_v1  ;;  %v64_v10 = vmul.f32 %v61_v8, %v57_v2  ;;  %v65_v11 = vmul.f32 %v60_v7, %v58_v3  ;;  %v66_v12 = vmul.f32 %v61_v8, %v59_v6 }
   0x4   :  { %v148_v13 = vunpack.c.0.s8 %v274_v5  ;;  %v150_v14 = vshrl.u32 %v149_v0, 7  ;;  %vm185_vm2 = vcmask 1043459   ;;  %vm187_vm3 = vcmask 1045509  }
   0x5   :  { %v71_v15 = vcombine.high %v63_v9, %v63_v9  ;;  %v72_v16 = vcombine.high %v64_v10, %v64_v10  ;;  %v73_v17 = vcombine.high %v65_v11, %v65_v11  ;;  %v74_v18 = vcombine.high %v66_v12, %v66_v12 }
   0x6   :  { %v80_v19 = vsel %vm79_vm0, %v63_v9, 0.0  ;;  %v94_v20 = vsel %vm79_vm0, %v64_v10, 0.0  ;;  %v108_v21 = vsel %vm79_vm0, %v65_v11, 0.0  ;;  %v122_v22 = vsel %vm79_vm0, %v66_v12, 0.0 }
   0x7   :  { %v81_v23 = vrot.slane %v80_v19, 4  ;;  %v87_v24 = vsel %vm79_vm0, %v71_v15, 0.0  ;;  %v95_v25 = vrot.slane %v94_v20, 4  ;;  %v101_v26 = vsel %vm79_vm0, %v72_v16, 0.0 }
   0x8   :  { %v88_v27 = vrot.slane %v87_v24, 4  ;;  %v102_v28 = vrot.slane %v101_v26, 4  ;;  %v109_v29 = vrot.slane %v108_v21, 4  ;;  %v115_v30 = vsel %vm79_vm0, %v73_v17, 0.0 }
   0x9   :  { %v82_v31 = vadd.f32 %v81_v23, %v80_v19  ;;  %v96_v32 = vadd.f32 %v95_v25, %v94_v20  ;;  %v116_v33 = vrot.slane %v115_v30, 4  ;;  %v123_v34 = vrot.slane %v122_v22, 4 }
   0xa   :  { %v89_v35 = vadd.f32 %v88_v27, %v87_v24  ;;  %v103_v36 = vadd.f32 %v102_v28, %v101_v26  ;;  %v110_v37 = vadd.f32 %v109_v29, %v108_v21  ;;  %v129_v38 = vsel %vm79_vm0, %v74_v18, 0.0 }
   0xb   :  { %v83_v39 = vrot.slane %v82_v31, 2  ;;  %v97_v40 = vrot.slane %v96_v32, 2  ;;  %v117_v41 = vadd.f32 %v116_v33, %v115_v30  ;;  %v124_v42 = vadd.f32 %v123_v34, %v122_v22 }
   0xc   :  { %v90_v43 = vrot.slane %v89_v35, 2  ;;  %v104_v44 = vrot.slane %v103_v36, 2  ;;  %v111_v45 = vrot.slane %v110_v37, 2  ;;  %v130_v46 = vrot.slane %v129_v38, 4 }
   0xd   :  { %v84_v47 = vadd.f32 %v83_v39, %v82_v31  ;;  %v98_v48 = vadd.f32 %v97_v40, %v96_v32  ;;  %v118_v49 = vrot.slane %v117_v41, 2  ;;  %v125_v50 = vrot.slane %v124_v42, 2 }
   0xe   :  { %v91_v51 = vadd.f32 %v90_v43, %v89_v35  ;;  %v105_v52 = vadd.f32 %v104_v44, %v103_v36  ;;  %v112_v53 = vadd.f32 %v111_v45, %v110_v37  ;;  %v131_v54 = vadd.f32 %v130_v46, %v129_v38 }
   0xf   :  { %v85_v55 = vrot.slane %v84_v47, 1  ;;  %v99_v56 = vrot.slane %v98_v48, 1  ;;  %v119_v57 = vadd.f32 %v118_v49, %v117_v41  ;;  %v126_v58 = vadd.f32 %v125_v50, %v124_v42 }
  0x10   :  { %v92_v59 = vrot.slane %v91_v51, 1  ;;  %v106_v60 = vrot.slane %v105_v52, 1  ;;  %v113_v61 = vrot.slane %v112_v53, 1  ;;  %v132_v62 = vrot.slane %v131_v54, 2 }
  0x11   :  { %v86_v63 = vadd.f32 %v85_v55, %v84_v47  ;;  %v100_v0 = vadd.f32 %v99_v56, %v98_v48  ;;  %v120_v1 = vrot.slane %v119_v57, 1  ;;  %v127_v2 = vrot.slane %v126_v58, 1 }
  0x12   :  { %v93_v3 = vadd.f32 %v92_v59, %v91_v51  ;;  %v107_v4 = vadd.f32 %v106_v60, %v105_v52  ;;  %v114_v6 = vadd.f32 %v113_v61, %v112_v53  ;;  %v133_v7 = vadd.f32 %v132_v62, %v131_v54 }
  0x13   :  { %v121_v8 = vadd.f32 %v120_v1, %v119_v57  ;;  %v128_v9 = vadd.f32 %v127_v2, %v126_v58  ;;  %v151_v15 = vsub.s32 %v148_v13, %v150_v14  ;;  %vm189_vm4 = vcmask 1047559  }
  0x14   :  { %v134_v10 = vrot.slane %v133_v7, 1  ;;  %v144_v11 = vcombine.low %v86_v63, %v93_v3  ;;  %v145_v12 = vcombine.low %v100_v0, %v107_v4  ;;  %vm220_vm5 = vcmask 1041408  }
  0x15   :  { %v161_v16 = vcombine.low %v114_v6, %v121_v8  ;;  %vm230_vm6 = vcmask 1024  }
  0x16   :  { %v135_v17 = vadd.f32 %v134_v10, %v133_v7  ;;  %v152_v18 = vrot.slane %v144_v11, %v151_v15  ;;  %v159_v19 = vrot.slane %v145_v12, %v151_v15 }
  0x17   :  { %v169_v21 = vrot.slane %v161_v16, %v151_v15 }
  0x18   :  { %v162_v20 = vcombine.low %v128_v9, %v135_v17  ;;  %v160_v23 = vcombine.low %v152_v18, %v159_v19 }
  0x1a   :  { %v176_v22 = vrot.slane %v162_v20, %v151_v15 }
  0x1c   :  { %v177_v24 = vcombine.low %v169_v21, %v176_v22 }
  0x1e   :  { %v182_v25 = vrot.slane %v177_v24, 7 }
  0x20   :  { %v184_v26 = vsel %vm183_vm1, %v182_v25, %v160_v23 }
  0x21   :  { %v186_v27 = vsel %vm185_vm2, %v182_v25, %v184_v26 }
  0x22   :  { %v188_v28 = vsel %vm187_vm3, %v182_v25, %v186_v27 }
  0x23   :  { %v190_v29 = vsel %vm189_vm4, %v182_v25, %v188_v28 }
  0x24   :  { %v199_v5 = vcombine.high %v190_v29, %v190_v29  ;;  %v206_v13 = vrot.slane %v190_v29, %v151_v15 }
  0x26   :  { %v213_v14 = vrot.slane %v199_v5, %v151_v15  ;;  %v214_v30 = vcombine.high %v206_v13, %v206_v13  ;;  %v221_v31 = vsel %vm220_vm5, %v206_v13, 0.0 }
  0x28   :  { %v215_v32 = vcombine.high %v213_v14, %v213_v14  ;;  %v222_v33 = vsel %vm220_vm5, %v214_v30, 0.0  ;;  %v224_v34 = vsel %vm220_vm5, %v213_v14, 0.0 }
  0x29   :  { %v223_v35 = vadd.f32 %v222_v33, %v221_v31 }
  0x2a   :  { %v226_v36 = vsel %vm220_vm5, %v215_v32, 0.0 }
  0x2b   :  { %v225_v37 = vadd.f32 %v224_v34, %v223_v35 }
  0x2d   :  { %v227_v38 = vadd.f32 %v226_v36, %v225_v37 }
  0x2f   :  { %228 = vadd.xlane.f32.xlu0 %v227_v38 }
  0xbc   :  { %v229_v39 = vpop.xlane.xlu0 %228 }
  0xbd   :  { %231 = vst.msk [vmem:[%s301_s2] sm:$0x3] %vm230_vm6, %v229_v39 }

// kernel: deepfake_detector_forward.3
= control target key start
LH: loop header
LB: loop body
LE: loop exit
PB: predicated region body
PF: predicated region fallthrough
CT: control target
= control target key end

     0   :  { %vm23_vm0 = vcmask 1024   ;;  %s57_s0 = inlined_call_operand.vmem [shape: f32[1,2,1], index: 0, kind: input, shape index: {}]   ;;  %s58_s1 = inlined_call_operand.<no memory space> [shape: f32[1], index: 1, kind: input, shape index: {}]   ;;  %s59_s2 = inlined_call_operand.vmem [shape: f32[2,1], index: 2, kind: output, shape index: {}]  }
   0x1   :  { %v12_v0 = vld [vmem:[%s57_s0] sm:$0x3]  ;;  %v15_v1 = vstv %s58_s1 }
   0x2   :  { %v16_v2 = vadd.f32 %v15_v1, %v12_v0 }
   0x4   :  { %v17_v3 = vsub.f32 0.0, %v16_v2 }
   0x6   :  { %v18_v4 = vmul.f32 1.442695, %v17_v3 }
   0x8   :  { %29 = vpow2.f32 %v18_v4 }
  0x12   :  { %v30_v5 = vpop.eup %29 }
  0x13   :  { %v20_v6 = vadd.f32 1.0, %v30_v5 }
  0x15   :  { %31 = vrcp.f32 %v20_v6 }
  0x1f   :  { %v32_v7 = vpop.eup %31 }
  0x20   :  { %24 = vst.msk [vmem:[%s59_s2] sm:$0x3] %vm23_vm0, %v32_v7 }

</bundles_post_ra>
